<compile_context>
chip_gen: v5e
topology: v5e:2x2
jax: 0.10.0
libtpu: 0.0.40
codegen_flags: <defaults>
</compile_context>

<pallas_src>
import functools

import jax
import jax.numpy as jnp
from jax.experimental import pallas as pl
from jax.experimental.pallas import tpu as pltpu

_LANE = 128
_SUBLANE = 8
_LARGE_V_THRESHOLD = 2048     # above this, switch to the DMA-gather path
_GATHER_WINDOW = 2            # double-buffered groups of 8 rows (8 DMAs in flight)


# ----------------------------------------------------------------------------
# Tile / VMEM sizing helpers
# ----------------------------------------------------------------------------
def _roundup(x, m):
    return ((x + m - 1) // m) * m


def _vmem_limit_bytes():
    """Generation-aware scoped-VMEM limit (~3/4 of physical, capped at 96 MiB)."""
    try:
        cap = int(pltpu.get_tpu_info().vmem_capacity_bytes)
    except Exception:
        cap = 64 * 1024 * 1024                 # conservative (v7x-sized) fallback
    return min((cap * 3) // 4, 96 * 1024 * 1024)


def _grid_floor_cap(tile, n_rows, min_blocks=4):
    """Cap the tile so the parallel grid axis has >= min_blocks blocks when the
    row count allows it (keeps both v7x TensorCores busy; negligible elsewhere)."""
    rows8 = _roundup(max(n_rows, 1), _SUBLANE)
    blocks = min(min_blocks, rows8 // _SUBLANE)
    if blocks > 1:
        cap = _roundup(pl.cdiv(n_rows, blocks), _SUBLANE)
        tile = min(tile, max(_SUBLANE, cap))
    return tile


def _pick_stream_tile(n_rows, vocab, itemsize, vmem_limit, max_tile=16384):
    """Largest row tile whose double-buffered blocks fit the VMEM budget.

    Per tile row (double-buffered):
      input row:              2 * vocab * itemsize
      target + mask blocks:   2 arrays * 2 buffers * 128 lanes * 4 B
                              (the (tile, 1) blocks are lane-padded to 128 in VMEM)
    """
    slack = 4 * 1024 * 1024                    # outputs + compiler scratch headroom
    per_row = 2 * vocab * itemsize + 2 * 2 * _LANE * 4
    budget = max(vmem_limit - slack, per_row)
    tile = budget // per_row
    tile = max(_SUBLANE, (tile // _SUBLANE) * _SUBLANE)
    tile = min(tile, max_tile, _roundup(max(n_rows, 1), _SUBLANE))
    return int(_grid_floor_cap(tile, n_rows))


def _pick_gather_tile(n_rows, max_tile=1024):
    tile = min(max_tile, _roundup(max(n_rows, 1), _SUBLANE))
    return int(_grid_floor_cap(tile, n_rows))


# ----------------------------------------------------------------------------
# Streaming kernel (small/moderate vocab): full (tile, V) block per step.
# ----------------------------------------------------------------------------
def _lm_criterion_stream_kernel(inp_ref, tgt_ref, msk_ref, num_ref, den_ref, *,
                                n_rows, tile):
    i = pl.program_id(0)

    logp = inp_ref[...]                            # (tile, V)   native dtype
    tgt = tgt_ref[...]                             # (tile, 1)   int32
    msk = msk_ref[...]                             # (tile, 1)   float32

    # gather(1, target): one-hot select along the lane (vocab) axis.
    # (1, V) iota row; the compare broadcasts it across sublanes (less VPU work).
    vocab_ids = jax.lax.broadcasted_iota(jnp.int32, (1, logp.shape[1]), 1)
    sel = jnp.where(vocab_ids == tgt, logp, jnp.zeros_like(logp))
    gathered = jnp.sum(sel, axis=1, keepdims=True).astype(jnp.float32)  # (tile,1)

    # Rows beyond n_rows (partial last block) must not contribute; use a select
    # (not a multiply) so NaN/garbage in the padded region is dropped.
    row_ids = i * tile + jax.lax.broadcasted_iota(jnp.int32, (tile, 1), 0)
    valid = row_ids < n_rows

    num_part = jnp.sum(jnp.where(valid, -gathered * msk, 0.0))
    den_part = jnp.sum(jnp.where(valid, msk, 0.0))

    # Lane-dense (1, 8, 128) partial outputs -> unmasked stores, no shared
    # accumulator, grid axis stays "parallel".
    num_ref[...] = jnp.broadcast_to(num_part, num_ref.shape)
    den_ref[...] = jnp.broadcast_to(den_part, den_ref.shape)


def _run_stream(inp2, tgt2, msk2, n_rows, vocab, tile, vmem_limit):
    if tile is None:
        tile = _pick_stream_tile(n_rows, vocab,
                                 jnp.dtype(inp2.dtype).itemsize, vmem_limit)
    grid = pl.cdiv(n_rows, tile)
    kernel = functools.partial(_lm_criterion_stream_kernel,
                               n_rows=n_rows, tile=tile)
    return pl.pallas_call(
        kernel,
        out_shape=(
            jax.ShapeDtypeStruct((grid, _SUBLANE, _LANE), jnp.float32),
            jax.ShapeDtypeStruct((grid, _SUBLANE, _LANE), jnp.float32),
        ),
        grid_spec=pltpu.PrefetchScalarGridSpec(
            num_scalar_prefetch=0,
            grid=(grid,),
            in_specs=[
                pl.BlockSpec((tile, vocab), lambda i: (i, 0)),
                pl.BlockSpec((tile, 1), lambda i: (i, 0)),
                pl.BlockSpec((tile, 1), lambda i: (i, 0)),
            ],
            out_specs=[
                pl.BlockSpec((1, _SUBLANE, _LANE), lambda i: (i, 0, 0)),
                pl.BlockSpec((1, _SUBLANE, _LANE), lambda i: (i, 0, 0)),
            ],
        ),
        compiler_params=pltpu.CompilerParams(
            dimension_semantics=("parallel",),
            vmem_limit_bytes=vmem_limit,
        ),
    )(inp2, tgt2, msk2)


# ----------------------------------------------------------------------------
# Gather kernel (large vocab): per row DMA only the 128-lane block that holds
# the target. Double-buffered groups of 8 rows (8 copies in flight).
# ----------------------------------------------------------------------------
def _lm_criterion_gather_kernel(tgt_smem, tgt_ref, msk_ref, inp_hbm,
                                num_ref, den_ref,
                                buf, sems, nacc, dacc, *,
                                n_rows, tile, vocab):
    i = pl.program_id(0)
    row0 = i * tile
    n_groups = tile // _SUBLANE                    # static python int (>= 1)
    max_col = max(vocab - _LANE, 0)

    nacc[...] = jnp.zeros_like(nacc)
    dacc[...] = jnp.zeros_like(dacc)

    def start_group(g, slot):
        # Issue 8 row-gather DMAs (one 128-lane block per row) into buf[slot].
        for j in range(_SUBLANE):
            r = jnp.minimum(row0 + g * _SUBLANE + j, n_rows - 1)  # clamp pad rows
            t = tgt_smem[r]
            c = jnp.clip((t // _LANE) * _LANE, 0, max_col)
            pltpu.make_async_copy(
                inp_hbm.at[pl.ds(r, 1), pl.ds(c, _LANE)],
                buf.at[slot, pl.ds(j, 1)],
                sems.at[slot, j],
            ).start()

    def wait_group(slot):
        for j in range(_SUBLANE):
            pltpu.make_async_copy(
                inp_hbm.at[pl.ds(0, 1), pl.ds(0, _LANE)],   # dummy src (shape only)
                buf.at[slot, pl.ds(j, 1)],
                sems.at[slot, j],
            ).wait()

    start_group(0, 0)                                # prime slot 0

    lane_iota = jax.lax.broadcasted_iota(jnp.int32, (1, _LANE), 1)

    @pl.loop(0, n_groups)
    def _(g):
        slot = g % _GATHER_WINDOW
        wait_group(slot)

        @pl.when(g + 1 < n_groups)
        def _():
            start_group(g + 1, 1 - slot)

        g8 = pl.multiple_of(g * _SUBLANE, _SUBLANE)
        tgt = tgt_ref[pl.ds(g8, _SUBLANE), :]                  # (8, 1) int32
        msk = msk_ref[pl.ds(g8, _SUBLANE), :]                  # (8, 1) f32
        col0 = jnp.clip((tgt // _LANE) * _LANE, 0, max_col)    # same col as DMA
        lane = tgt - col0                                      # lane within block

        vals = buf[slot]                                       # (8, 128) native
        sel = jnp.where(lane_iota == lane, vals, jnp.zeros_like(vals))
        gathered = jnp.sum(sel, axis=1, keepdims=True).astype(jnp.float32)

        rows = row0 + g8 + jax.lax.broadcasted_iota(jnp.int32, (_SUBLANE, 1), 0)
        valid = rows < n_rows
        nacc[...] += jnp.broadcast_to(jnp.where(valid, -gathered * msk, 0.0),
                                      nacc.shape)
        dacc[...] += jnp.broadcast_to(jnp.where(valid, msk, 0.0), dacc.shape)

    num_ref[...] = jnp.broadcast_to(jnp.sum(nacc[:, 0:1]), num_ref.shape)
    den_ref[...] = jnp.broadcast_to(jnp.sum(dacc[:, 0:1]), den_ref.shape)


def _run_gather(inp2, tgt2, msk2, n_rows, vocab, tile, vmem_limit):
    if tile is None:
        tile = _pick_gather_tile(n_rows)
    grid = pl.cdiv(n_rows, tile)
    tgt_flat = tgt2.reshape(n_rows)
    kernel = functools.partial(_lm_criterion_gather_kernel,
                               n_rows=n_rows, tile=tile, vocab=vocab)
    return pl.pallas_call(
        kernel,
        out_shape=(
            jax.ShapeDtypeStruct((grid, _SUBLANE, _LANE), jnp.float32),
            jax.ShapeDtypeStruct((grid, _SUBLANE, _LANE), jnp.float32),
        ),
        grid_spec=pltpu.PrefetchScalarGridSpec(
            num_scalar_prefetch=1,                       # targets -> SMEM
            grid=(grid,),
            in_specs=[
                pl.BlockSpec((tile, 1), lambda i, tgt: (i, 0)),   # targets (VMEM)
                pl.BlockSpec((tile, 1), lambda i, tgt: (i, 0)),   # mask
                pl.BlockSpec(memory_space=pl.ANY),                # log-probs (HBM)
            ],
            out_specs=[
                pl.BlockSpec((1, _SUBLANE, _LANE), lambda i, tgt: (i, 0, 0)),
                pl.BlockSpec((1, _SUBLANE, _LANE), lambda i, tgt: (i, 0, 0)),
            ],
            scratch_shapes=[
                pltpu.VMEM((_GATHER_WINDOW, _SUBLANE, _LANE), inp2.dtype),
                pltpu.SemaphoreType.DMA((_GATHER_WINDOW, _SUBLANE)),
                pltpu.VMEM((_SUBLANE, _LANE), jnp.float32),
                pltpu.VMEM((_SUBLANE, _LANE), jnp.float32),
            ],
        ),
        compiler_params=pltpu.CompilerParams(
            dimension_semantics=("parallel",),
            vmem_limit_bytes=vmem_limit,
        ),
    )(tgt_flat, tgt2, msk2, inp2)


# ----------------------------------------------------------------------------
# Public wrapper (same semantics as the PyTorch LanguageModelCriterion.forward)
# ----------------------------------------------------------------------------
def language_model_criterion(inp, target, mask, *, tile=None):
    B, T, V = inp.shape
    N = B * T

    inp2 = inp.reshape(N, V)                        # native dtype, no astype copy
    tgt2 = target.reshape(N, 1).astype(jnp.int32)
    msk2 = mask.reshape(N, 1).astype(jnp.float32)

    vmem_limit = _vmem_limit_bytes()

    if V > _LARGE_V_THRESHOLD and V >= _LANE:
        num_out, den_out = _run_gather(inp2, tgt2, msk2, N, V, tile, vmem_limit)
    else:
        num_out, den_out = _run_stream(inp2, tgt2, msk2, N, V, tile, vmem_limit)

    num = jnp.sum(num_out[:, 0, 0])
    den = jnp.sum(den_out[:, 0, 0])
    return num / den                                 # unguarded, like PyTorch


# ----------------------------------------------------------------------------
# Demo / self-test
# ----------------------------------------------------------------------------
def _reference(logprobs, target, mask):
    B, T, V = logprobs.shape
    flat_lp = logprobs.reshape(-1, V)
    flat_t = target.reshape(-1)
    flat_m = mask.reshape(-1)
    return jnp.sum(-flat_lp[jnp.arange(B * T), flat_t] * flat_m) / jnp.sum(flat_m)


def _make_inputs(key, B, T, V):
    k1, k2, k3 = jax.random.split(key, 3)
    logits = jax.random.normal(k1, (B, T, V), dtype=jnp.float32)
    logprobs = jax.nn.log_softmax(logits, axis=-1)
    target = jax.random.randint(k2, (B, T), 0, V, dtype=jnp.int32)
    lens = jax.random.randint(k3, (B, 1), 1, T + 1)
    mask = (jnp.arange(T)[None, :] < lens).astype(jnp.float32)
    return logprobs, target, mask


if __name__ == "__main__":
    key = jax.random.PRNGKey(0)
    k_small, k_large = jax.random.split(key)

    # Path 1: small vocab -> streaming kernel.
    lp_s, tgt_s, msk_s = _make_inputs(k_small, B=2, T=8, V=128)
    loss_s = jax.block_until_ready(language_model_criterion(lp_s, tgt_s, msk_s))
    ref_s = _reference(lp_s, tgt_s, msk_s)
    assert jnp.allclose(loss_s, ref_s, rtol=1e-5, atol=1e-6), (loss_s, ref_s)

    # Path 2: large vocab -> scalar-prefetch + manual 128-lane DMA gather.
    lp_l, tgt_l, msk_l = _make_inputs(k_large, B=4, T=16, V=4096)
    loss_l = jax.block_until_ready(language_model_criterion(lp_l, tgt_l, msk_l))
    ref_l = _reference(lp_l, tgt_l, msk_l)
    assert jnp.allclose(loss_l, ref_l, rtol=1e-5, atol=1e-6), (loss_l, ref_l)

    print("KERNEL_OK")
</pallas_src>

<mosaic_0001>
module attributes {stable_mosaic.version = 11 : i64} {
  func.func @_lm_criterion_stream_kernel(%arg0: i32, %arg1: memref<8x128xf32, #tpu.memory_space<vmem>>, %arg2: memref<8x1xi32, #tpu.memory_space<vmem>>, %arg3: memref<8x1xf32, #tpu.memory_space<vmem>>, %arg4: memref<1x8x128xf32, #tpu.memory_space<vmem>>, %arg5: memref<1x8x128xf32, #tpu.memory_space<vmem>>) attributes {dimension_semantics = [#tpu.dimension_semantics<parallel>], iteration_bounds = array<i64: 2>, scalar_prefetch = 0 : i64, scratch_operands = 0 : i64, tpu.core_type = #tpu.core_type<tc>, window_params = [{transform_indices = @transform_0, window_bounds = array<i64: 8, 128>}, {transform_indices = @transform_1, window_bounds = array<i64: 8, 1>}, {transform_indices = @transform_2, window_bounds = array<i64: 8, 1>}, {transform_indices = @transform_3, window_bounds = array<i64: 1, 8, 128>}, {transform_indices = @transform_4, window_bounds = array<i64: 1, 8, 128>}]} {
    %c0 = arith.constant 0 : index
    %c0_0 = arith.constant 0 : index
    %0 = vector.load %arg1[%c0, %c0_0] : memref<8x128xf32, #tpu.memory_space<vmem>>, vector<8x128xf32>
    %c0_1 = arith.constant 0 : index
    %c0_2 = arith.constant 0 : index
    %1 = vector.load %arg2[%c0_1, %c0_2] : memref<8x1xi32, #tpu.memory_space<vmem>>, vector<8x1xi32>
    %c0_3 = arith.constant 0 : index
    %c0_4 = arith.constant 0 : index
    %2 = vector.load %arg3[%c0_3, %c0_4] : memref<8x1xf32, #tpu.memory_space<vmem>>, vector<8x1xf32>
    %3 = tpu.iota {dimensions = array<i32: 1>} : vector<1x128xi32>
    %4 = vector.broadcast %3 : vector<1x128xi32> to vector<8x128xi32>
    %5 = vector.broadcast %1 : vector<8x1xi32> to vector<8x128xi32>
    %6 = arith.cmpi eq, %4, %5 : vector<8x128xi32>
    %cst = arith.constant 0.000000e+00 : f32
    %7 = vector.broadcast %cst : f32 to vector<8x128xf32>
    %8 = arith.select %6, %0, %7 : vector<8x128xi1>, vector<8x128xf32>
    %cst_5 = arith.constant dense<0.000000e+00> : vector<8xf32>
    %9 = vector.multi_reduction <add>, %8, %cst_5 [1] : vector<8x128xf32> to vector<8xf32>
    %10 = vector.shape_cast %9 : vector<8xf32> to vector<8x1xf32>
    %c8_i32 = arith.constant 8 : i32
    %11 = arith.muli %arg0, %c8_i32 : i32
    %12 = tpu.iota {dimensions = array<i32: 0>} : vector<8x1xi32>
    %13 = vector.broadcast %11 : i32 to vector<8x1xi32>
    %14 = arith.addi %13, %12 : vector<8x1xi32>
    %c16_i32 = arith.constant 16 : i32
    %15 = vector.broadcast %c16_i32 : i32 to vector<8x1xi32>
    %16 = arith.cmpi slt, %14, %15 : vector<8x1xi32>
    %cst_6 = arith.constant 0.000000e+00 : f32
    %17 = vector.broadcast %cst_6 : f32 to vector<8x1xf32>
    %18 = arith.subf %17, %10 : vector<8x1xf32>
    %19 = arith.mulf %18, %2 : vector<8x1xf32>
    %cst_7 = arith.constant 0.000000e+00 : f32
    %20 = vector.broadcast %cst_7 : f32 to vector<8x1xf32>
    %21 = arith.select %16, %19, %20 : vector<8x1xi1>, vector<8x1xf32>
    %22 = vector.shape_cast %21 : vector<8x1xf32> to vector<1x8x1xf32>
    %cst_8 = arith.constant dense<0.000000e+00> : vector<1xf32>
    %23 = vector.multi_reduction <add>, %22, %cst_8 [1, 2] : vector<1x8x1xf32> to vector<1xf32>
    %24 = vector.shape_cast %23 : vector<1xf32> to vector<1x1x1xf32>
    %25 = vector.extract %24[0, 0, 0] : f32 from vector<1x1x1xf32>
    %cst_9 = arith.constant 0.000000e+00 : f32
    %26 = vector.broadcast %cst_9 : f32 to vector<8x1xf32>
    %27 = arith.select %16, %2, %26 : vector<8x1xi1>, vector<8x1xf32>
    %28 = vector.shape_cast %27 : vector<8x1xf32> to vector<1x8x1xf32>
    %cst_10 = arith.constant dense<0.000000e+00> : vector<1xf32>
    %29 = vector.multi_reduction <add>, %28, %cst_10 [1, 2] : vector<1x8x1xf32> to vector<1xf32>
    %30 = vector.shape_cast %29 : vector<1xf32> to vector<1x1x1xf32>
    %31 = vector.extract %30[0, 0, 0] : f32 from vector<1x1x1xf32>
    %32 = vector.broadcast %25 : f32 to vector<1x8x128xf32>
    %c0_11 = arith.constant 0 : index
    %c0_12 = arith.constant 0 : index
    %c0_13 = arith.constant 0 : index
    %33 = vector.load %arg4[%c0_11, %c0_12, %c0_13] : memref<1x8x128xf32, #tpu.memory_space<vmem>>, vector<1x8x128xf32>
    tpu.vector_store %arg4[%c0_11, %c0_12, %c0_13], %32 {strides = array<i32>} : memref<1x8x128xf32, #tpu.memory_space<vmem>>, vector<1x8x128xf32>,
    %34 = vector.broadcast %31 : f32 to vector<1x8x128xf32>
    %c0_14 = arith.constant 0 : index
    %c0_15 = arith.constant 0 : index
    %c0_16 = arith.constant 0 : index
    %35 = vector.load %arg5[%c0_14, %c0_15, %c0_16] : memref<1x8x128xf32, #tpu.memory_space<vmem>>, vector<1x8x128xf32>
    tpu.vector_store %arg5[%c0_14, %c0_15, %c0_16], %34 {strides = array<i32>} : memref<1x8x128xf32, #tpu.memory_space<vmem>>, vector<1x8x128xf32>,
    return
  }
  func.func @transform_0(%arg0: i32) -> (i32, i32) {
    %c0_i32 = arith.constant 0 : i32
    %c0_i32_0 = arith.constant 0 : i32
    return %arg0, %c0_i32 : i32, i32
  }
  func.func @transform_1(%arg0: i32) -> (i32, i32) {
    %c0_i32 = arith.constant 0 : i32
    %c0_i32_0 = arith.constant 0 : i32
    return %arg0, %c0_i32 : i32, i32
  }
  func.func @transform_2(%arg0: i32) -> (i32, i32) {
    %c0_i32 = arith.constant 0 : i32
    %c0_i32_0 = arith.constant 0 : i32
    return %arg0, %c0_i32 : i32, i32
  }
  func.func @transform_3(%arg0: i32) -> (i32, i32, i32) {
    %c0_i32 = arith.constant 0 : i32
    %c0_i32_0 = arith.constant 0 : i32
    %c0_i32_1 = arith.constant 0 : i32
    return %arg0, %c0_i32, %c0_i32_0 : i32, i32, i32
  }
  func.func @transform_4(%arg0: i32) -> (i32, i32, i32) {
    %c0_i32 = arith.constant 0 : i32
    %c0_i32_0 = arith.constant 0 : i32
    %c0_i32_1 = arith.constant 0 : i32
    return %arg0, %c0_i32, %c0_i32_0 : i32, i32, i32
  }
}

</mosaic_0001>

<bundles_post_ra>
// kernel: tpu_custom_call.1
= control target key start
LH: loop header
LB: loop body
LE: loop exit
PB: predicated region body
PF: predicated region fallthrough
CT: control target
= control target key end

     0   :  { %10 = vsyncpa [#allocation3], 0  ;;  %s738_s0 = inlined_call_operand.vmem [shape: f32[16,128], index: 0, kind: input, shape index: {}]   ;;  %s739_s1 = inlined_call_operand.vmem [shape: s32[16,1], index: 1, kind: input, shape index: {}]   ;;  %s740_s2 = inlined_call_operand.vmem [shape: f32[16,1], index: 2, kind: input, shape index: {}]   ;;  %s741_s3 = inlined_call_operand.hbm [shape: f32[2,8,128], index: 3, kind: output, shape index: {0}]   ;;  %s742_s4 = inlined_call_operand.hbm [shape: f32[2,8,128], index: 4, kind: output, shape index: {1}]  }
   0x1   :  { %12 = vsyncpa [#allocation3 + $0x1], 0 }
   0x2   :  { %13 = vsyncpa [#allocation5], 0 }
   0x3   :  { %15 = vsyncpa [#allocation5 + $0x1], 0  ;;  %s624_s15 = smov 0   ;;  %s626_s16 = smov 0  }
   0x4   :  { %s628_s17 = smov 0   ;;  %s630_s18 = smov 0  }
   0x5 LB: > { %s645_s19 = sadd.s32 4294967295, %s596_s18   ;;  %s436_s20 = sadd.s32 4294967294, %s596_s18   ;;  %s596_s18 = sphi %s630_s18, %s748_s18   ;;  %s592_s17 = sphi %s628_s17, %s747_s17   ;;  %s588_s16 = sphi %s626_s16, %s746_s16   ;;  %s584_s15 = sphi %s624_s15, %s745_s15  }
   0x6   : > { %s649_s21 = sadd.s32 1, %s596_s18   ;;  %s106_s22 = sadd.s32 1, %s592_s17 }
   0x7   : > { %s103_s23 = ssub.s32 %s596_s18, %s649_s21  ;;  %p116_p0 = scmp.ne.s32.totalorder %s592_s17, %s588_s16 }
   0x8   : > { %p104_p1 = scmp.eq.s32.totalorder %s103_s23, 0  ;;  %p117_p2 = scmp.eq.s32.totalorder %s645_s19, 1 }
   0x9   : > { %p122_p3 = scmp.ne.s32.totalorder %s588_s16, %s584_s15  ;;  %p123_p4 = scmp.eq.s32.totalorder %s436_s20, 1 }
   0xa   : > { %s660_s24 = scalar_select %p104_p1, %s592_s17, %s106_s22  }
   0xb   : > { %p662_p5 = por %p117_p2, %p116_p0  ;;  %p666_p6 = por %p123_p4, %p122_p3 }
   0xc   : > { %p439_p7 = scmp.ge.s32.totalorder %s596_s18, 1  ;;  %p188_p8 = scmp.lt.s32.totalorder %s596_s18, 3 }
   0xe   : > { %p189_p9 = pnand %p439_p7, %p188_p8 }
   0xf   : > { %p226_p10 = scmp.lt.s32.totalorder (!%p189_p9), %s645_s19, 1  ;;  %s681_s9 = sshll.u32 (!%p189_p9), %s645_s19, 3 }
  0x10   : > { %192 = sbr.rel (%p189_p9) target bundleno = 461 (0x1cd), region = 32  ;;  %s688_s13 = sand.u32 (!%p189_p9), 1, %s588_s16  }
  0x11   : > { %s440_s14 = sshll.u32 (!%p189_p9), %s688_s13, 3  ;;  %s301_s22 = scalar_lea.hbm (!%p189_p9), %s741_s3, %s681_s9 }
  0x12   : > { %s218_s23 = scalar_lea.vmem (!%p189_p9), [#allocation2], %s440_s14  ;;  %s315_s6 = scalar_lea.hbm (!%p189_p9), %s742_s4, %s681_s9 }
  0x13   : > { %s286_s7 = scalar_lea.sflag (!%p189_p9), [#allocation3], %s688_s13 }
  0x15   : > { %v598_v0 = vmov 0   ;;  %s227_s27 = scalar_select %p226_p10, %s645_s19, 1  ;;  %v241_v2 = vlaneseq  ;;  %v253_v8 = vstv %s681_s9  ;;  %vm259_vm2 = vcmask 7168  }
  0x16   : > { %501 = vset.pattern.permute.xlu0 %v598_v0  ;;  %s522_s19 = scalar_lea.hbm %s741_s3, 16 }
  0x17   : > { %s442_s28 = sshll.u32 %s227_s27, 3  ;;  %v242_v3 = vand.u32 127, %v241_v2  ;;  %v252_v7 = vshrl.u32 %v241_v2, 7  ;;  %s303_s27 = sshll.u32 %s218_s23, 4  ;;  %s304_s27 = int_to_ptr.vmem [resolvable:$true] %s303_s27 }
  0x18   : > { %s233_s5 = scalar_lea.vmem %s739_s1, %s442_s28  ;;  %s229_s8 = scalar_lea.vmem %s738_s0, %s442_s28 }
  0x19   : > { %v239_v1 = vld [vmem:[%s233_s5] sm:$0xff]  ;;  %s237_s12 = scalar_lea.vmem %s740_s2, %s442_s28  ;;  %v254_v9 = vadd.s32 %v253_v8, %v252_v7  ;;  %s305_s28 = sshll.u32 %s301_s22, 4  ;;  %s306_s28 = int_to_ptr.hbm [resolvable:$true] %s305_s28 }
  0x1a   : > { %244 = vperm.xlu0 %501, %v239_v1   ;;  %v238_v4 = vld [vmem:[%s229_s8] sm:$0xff]  ;;  %s516_s8 = sshra.s32 %s306_s28, 4  ;;  %s517_s8 = int_to_ptr.hbm [resolvable:$true] %s516_s8 }
  0x1b   : > { %v240_v10 = vld [vmem:[%s237_s12] sm:$0xff]  ;;  %vm255_vm1 = vcmp.lt.s32.totalorder %v254_v9, 16  ;;  %s518_s10 = scalar_lea.hbm %s517_s8, 8  ;;  %p523_p0 = scmp.lt.s32.totalorder %s517_s8, %s741_s3 }
  0x1c   : > { %v270_v16 = vsel %vm255_vm1, %v240_v10, 0.0  ;;  %p519_p11 = scmp.ne.s32.totalorder %s517_s8, %s518_s10  ;;  %p524_p1 = scmp.lt.s32.totalorder %s522_s19, %s518_s10 }
  0x1d   : > { %v271_v17 = vsel %vm259_vm2, %v270_v16, 0.0 }
  0x1e   : > { %p520_p12 = pnand %p519_p11, %p662_p5  ;;  %p525_p2 = por %p524_p1, %p523_p0 }
  0x20   : > { %p521_p13 = pneg %p520_p12 }
  0x22   : > { %p526_p3 = pnand %p525_p2, %p521_p13 }
  0x8c   : > { %v245_v5 = vpop.permute.xlu0 %244 }
  0x8d   : > { %vm246_vm0 = vcmp.eq.s32.totalorder %v242_v3, %v245_v5 }
  0x8e   : > { %v247_v6 = vsel %vm246_vm0, %v238_v4, 0.0 }
  0x8f   : > { %248 = vadd.xlane.f32.xlu0 %v247_v6 }
 0x102   : > { %v249_v11 = vpop.xlane.xlu0 %248 }
 0x103   : > { %v256_v12 = vsub.f32 0.0, %v249_v11 }
 0x105   : > { %v257_v13 = vmul.f32 %v256_v12, %v240_v10 }
 0x107   : > { %v258_v14 = vsel %vm255_vm1, %v257_v13, 0.0 }
 0x108   : > { %v260_v15 = vsel %vm259_vm2, %v258_v14, 0.0 }
 0x109   : > { %261 = vadd.xlane.f32.xlu1 %v260_v15 }
 0x111   : > { %272 = vadd.xlane.f32.xlu1 %v271_v17 }
 0x17c   : > { %v262_v18 = vpop.xlane.xlu1 %261 }
 0x17d   : > { %v263_v19 = vrot.slane %v262_v18, 4 }
 0x17f   : > { %v264_v20 = vadd.f32 %v263_v19, %v262_v18 }
 0x181   : > { %v265_v21 = vrot.slane %v264_v20, 2 }
 0x183   : > { %v266_v22 = vadd.f32 %v265_v21, %v264_v20 }
 0x184   : > { %v273_v23 = vpop.xlane.xlu1 %272 }
 0x185   : > { %v274_v24 = vrot.slane %v273_v23, 4  ;;  %v267_v25 = vrot.slane %v266_v22, 1 }
 0x187   : > { %v275_v26 = vadd.f32 %v274_v24, %v273_v23  ;;  %v268_v27 = vadd.f32 %v267_v25, %v266_v22 }
 0x189   : > { %v276_v28 = vrot.slane %v275_v26, 2  ;;  %452 = vpush %v268_v27 }
 0x18b   : > { %v277_v29 = vadd.f32 %v276_v28, %v275_v26 }
 0x18d   : > { %v278_v30 = vrot.slane %v277_v29, 1 }
 0x18f   : > { %v279_v31 = vadd.f32 %v278_v30, %v277_v29 }
 0x191   : > { %454 = vpush %v279_v31 }
 0x1ba   : > { %s453_s29 = spop %452 }
 0x1bb   : > { %v281_v32 = vstv %s453_s29 }
 0x1bc   : > { %282 = vst [vmem:[%s218_s23] sm:$0xff] %v281_v32 }
 0x1bd   : > { %529 = shalt.err (!%p526_p3)
}
 0x1be   : > { %456 = dma.vmem_to_hbm [thread:$0]  (%p662_p5), %s304_s27, 128, %s306_s28, %s286_s7  }
 0x1bf   : > { %s225_s9 = scalar_lea.vmem [#allocation4], %s440_s14  ;;  %s319_s29 = sshll.u32 %s315_s6, 4  ;;  %s320_s29 = int_to_ptr.hbm [resolvable:$true] %s319_s29 }
 0x1c0   : > { %s317_s23 = sshll.u32 %s225_s9, 4  ;;  %s291_s5 = scalar_lea.sflag [#allocation5], %s688_s13  ;;  %s318_s23 = int_to_ptr.vmem [resolvable:$true] %s317_s23 }
 0x1c1   : > { %s544_s11 = sshra.s32 %s320_s29, 4  ;;  %s550_s27 = scalar_lea.hbm %s742_s4, 16  ;;  %s545_s11 = int_to_ptr.hbm [resolvable:$true] %s544_s11 }
 0x1c2   : > { %s455_s30 = spop %454  ;;  %s546_s8 = scalar_lea.hbm %s545_s11, 8 }
 0x1c3   : > { %v283_v33 = vstv %s455_s30  ;;  %p547_p4 = scmp.ne.s32.totalorder %s545_s11, %s546_s8  ;;  %p551_p9 = scmp.lt.s32.totalorder %s545_s11, %s742_s4 }
 0x1c4   : > { %284 = vst [vmem:[%s225_s9] sm:$0xff] %v283_v33  ;;  %p552_p10 = scmp.lt.s32.totalorder %s550_s27, %s546_s8 }
 0x1c5   : > { %p548_p7 = pnand %p547_p4, %p662_p5 }
 0x1c6   : > { %p553_p11 = por %p552_p10, %p551_p9 }
 0x1c7   : > { %p549_p8 = pneg %p548_p7 }
 0x1c9   : > { %p554_p12 = pnand %p553_p11, %p549_p8 }
 0x1cb   : > { %557 = shalt.err (!%p554_p12)
}
 0x1cc   : > { %457 = dma.vmem_to_hbm [thread:$0]  (%p662_p5), %s318_s23, 128, %s320_s29, %s291_s5  }
 0x1cd PF: > { %p467_p13 = scmp.ge.s32.totalorder %s596_s18, 2  ;;  %s331_s13 = sand.u32 1, %s584_s15  }
 0x1ce   : > { %s332_s6 = scalar_lea.sflag [#allocation3], %s331_s13 }
 0x1cf   : > { %p461_p0 = pnand %p467_p13, %p666_p6 }
 0x1d1   : > { %p462_p1 = pneg %p461_p0 }
 0x1d3   : > { %575 = dma.done.wait (%p462_p1), %s332_s6, 128  }
 0x1d4   : > { %577 = vsyncadd (%p462_p1), %s332_s6, 4294967168  ;;  %s342_s7 = scalar_lea.sflag [#allocation5], %s331_s13 }
 0x1d5   : > { %579 = dma.done.wait (%p462_p1), %s342_s7, 128  }
 0x1d6   : > { %581 = vsyncadd (%p462_p1), %s342_s7, 4294967168  ;;  %p18_p5 = scmp.ge.s32.totalorder %s649_s21, 4   ;;  %s745_s15 = smov %s588_s16 }
 0x1d7   : > { %s746_s16 = smov %s592_s17  ;;  %s747_s17 = smov %s660_s24 }
 0x1d8   : > { %s748_s18 = smov %s649_s21  ;;  %20 = sbr.rel (!%p18_p5) target bundleno = 5 (0x5), region = 90 }
 0x1dd   :  { %348 = vsyncpa [#allocation3], 1 }
 0x1de   :  { %350 = vsyncpa [#allocation3 + $0x1], 1 }
 0x1df   :  { %351 = vsyncpa [#allocation5], 1 }
 0x1e0   :  { %353 = vsyncpa [#allocation5 + $0x1], 1 }

</bundles_post_ra>
